<compile_context>
chip_gen: v7x
topology: tpu7x:2x2x1
jax: 0.10.0
libtpu: 0.0.40
codegen_flags: <defaults>
</compile_context>

<pallas_src>
import functools
import math

import numpy as np
import jax
import jax.numpy as jnp
from jax import lax
from jax.experimental import pallas as pl
from jax.experimental.pallas import tpu as pltpu


def _round_up(v, mult):
    return (v + mult - 1) // mult * mult


def _gcn_kernel(nbr_ref, xn_ref, w_ref, b_ref, o_ref, *, compute_dtype):
    # nbr_ref: (m, ti)  i32            neighbor indices for the output-row tile (value == n_orig -> zero row)
    # xn_ref:  (d, tj)  compute_dtype  pre-normalized features of the source-row tile, transposed
    # w_ref:   (d, d)   compute_dtype  block-diagonal per-capsule weights, transposed (W^T)
    # b_ref:   (d, 1)   f32            concatenated per-capsule biases (broadcast over lanes)
    # o_ref:   (d, ti)  f32            output tile u^T (resident across the j axis; also holds z^T)
    j = pl.program_id(1)
    nj = pl.num_programs(1)
    d, tj = xn_ref.shape
    m, ti = nbr_ref.shape

    @pl.when(j == 0)
    def _():
        o_ref[...] = jnp.zeros_like(o_ref)

    # --- adjacency^T sub-block: adjT[c, r] = #{slots s : nbr[r, s] == j*tj + c} ---
    # Offset is applied to the tiny (m, ti) neighbor block; counts accumulate in int32.
    nb_loc = nbr_ref[...] - j * tj                                  # (m, ti) i32
    src = lax.broadcasted_iota(jnp.int32, (tj, ti), 0)              # sublane index = local source row
    adj = jnp.zeros((tj, ti), jnp.int32)
    for s in range(m):                                              # m is tiny -> trace-time unroll
        adj = adj + (nb_loc[s:s + 1, :] == src).astype(jnp.int32)

    # Counts are small exact integers -> exact in bf16; f32 accumulation directly in o_ref.
    o_ref[...] += jnp.dot(xn_ref[...], adj.astype(compute_dtype),
                          preferred_element_type=jnp.float32)

    # --- finalize: block-diagonal per-capsule linear + bias, u^T = W^T @ z^T + b ---
    @pl.when(j == nj - 1)
    def _():
        z = o_ref[...].astype(compute_dtype)                        # (d, ti)
        o_ref[...] = jnp.dot(w_ref[...], z,
                             preferred_element_type=jnp.float32) + b_ref[...]


def gcn_layer_forward(x, neighbors, w_blockdiag, bias, num_caps,
                      *, tile_i=512, tile_j=512, compute_dtype=jnp.bfloat16):
    """x: (n, d) f32, neighbors: (n*m,) int32 with values in [0, n] (n == zero row)."""
    n, d = x.shape
    k = num_caps
    dd = d // k
    m = neighbors.shape[0] // n

    # --- tile sizing: 128-multiples on both node axes (lane-mapped dims), padded
    #     independently; keep the parallel i axis >= 2 tiles when possible (v7x has 2 TCs). ---
    n128 = _round_up(n, 128)
    ti = max(128, min(_round_up(tile_i, 128), n128))
    if n128 >= 256:
        ti = min(ti, max(128, (n128 // 2) // 128 * 128))
    tj = max(128, min(_round_up(tile_j, 128), n128))
    n_pad_i = _round_up(n, ti)
    n_pad_j = _round_up(n, tj)
    ni, nj = n_pad_i // ti, n_pad_j // tj

    # --- hoisted per-capsule L2 normalization (pure-JAX pre-pass, done once, not ni times) ---
    xf = x.astype(jnp.float32)
    xv = xf.reshape(n, k, dd)
    inv = lax.rsqrt(jnp.maximum(jnp.sum(xv * xv, axis=2, keepdims=True), 1e-24))
    xn = (xv * inv).reshape(n, d)                                   # == x / max(||.||, 1e-12)

    # Transposed (lane-dense) operands.  Padded source columns are zero, so any adjacency
    # hit on them contributes nothing; the module's zero-row sentinel (index == n) either
    # lands on such a zero column or falls outside every tile's local index range.
    xnT = jnp.zeros((d, n_pad_j), compute_dtype).at[:, :n].set(xn.T.astype(compute_dtype))
    nb = neighbors.reshape(n, m).astype(jnp.int32).T                # (m, n)
    nbT = jnp.full((m, n_pad_i), n, jnp.int32).at[:, :n].set(nb)
    wT = w_blockdiag.T.astype(compute_dtype)                        # (d, d)
    b2 = bias.reshape(d, 1).astype(jnp.float32)

    # --- VMEM budget (double-buffered blocks + int32/bf16 adjacency temporaries), capped by
    #     the chip's physical VMEM (v7x: 64 MiB) instead of a hard-coded ceiling. ---
    csize = jnp.dtype(compute_dtype).itemsize
    est = (2 * (m * ti * 4 + d * tj * csize + d * ti * 4)
           + 2 * (d * d * csize + d * 128 * 4)
           + ti * tj * (4 + csize)
           + d * max(ti, tj) * 4)
    try:
        vmem_cap = int(getattr(pltpu.get_tpu_info(), "vmem_capacity_bytes",
                               64 * 1024 * 1024))
    except Exception:
        vmem_cap = 64 * 1024 * 1024
    vmem_limit = int(min(max(4 * est, 32 * 1024 * 1024), (vmem_cap * 3) // 4))

    kernel = functools.partial(_gcn_kernel, compute_dtype=compute_dtype)

    out_t = pl.pallas_call(
        kernel,
        out_shape=jax.ShapeDtypeStruct((d, n_pad_i), jnp.float32),
        grid=(ni, nj),
        in_specs=[
            pl.BlockSpec((m, ti), lambda i, j: (0, i)),   # neighbor table (output-row tile)
            pl.BlockSpec((d, tj), lambda i, j: (0, j)),   # normalized features^T (source tile)
            pl.BlockSpec((d, d), lambda i, j: (0, 0)),    # block-diagonal capsule weights^T
            pl.BlockSpec((d, 1), lambda i, j: (0, 0)),    # concatenated biases (column)
        ],
        out_specs=pl.BlockSpec((d, ti), lambda i, j: (0, i)),
        compiler_params=pltpu.CompilerParams(
            dimension_semantics=("parallel", "arbitrary"),
            vmem_limit_bytes=vmem_limit),
    )(nbT, xnT, wT, b2)
    return out_t[:, :n].T


def _reference(x, neighbors, w_blockdiag, bias, num_caps):
    # Pure-JAX reference of the PyTorch forward for correctness checking.
    n, d = x.shape
    k = num_caps
    dd = d // k
    m = neighbors.shape[0] // n
    xv = x.reshape(n, k, dd)
    norm = jnp.maximum(jnp.linalg.norm(xv, axis=2, keepdims=True), 1e-12)
    xn = (xv / norm).reshape(n, d)
    z_pad = jnp.concatenate([xn, jnp.zeros((1, d), jnp.float32)], axis=0)
    z = z_pad[neighbors].reshape(n, m, d).sum(axis=1)
    return z @ w_blockdiag + bias[None, :]


if __name__ == "__main__":
    # Small shapes consistent with the module: dim=32, num_caps=4 -> delta_d=8
    dim, num_caps = 32, 4
    delta_d = dim // num_caps
    n, m = 300, 8   # n > 128 so the multi-tile accumulation + padding paths are exercised

    key = jax.random.PRNGKey(0)
    kx, knb, kw, kb = jax.random.split(key, 4)

    x = jax.random.normal(kx, (n, dim), dtype=jnp.float32)
    # neighbor indices in [0, n]; value n selects the cached zero row
    neighbors = jax.random.randint(knb, (n * m,), 0, n + 1, dtype=jnp.int32)

    # Deterministic parameter init mimicking kaiming_uniform_(fan_out, a=sqrt(5)).
    bound = 1.0 / math.sqrt(delta_d)
    w_caps = jax.random.uniform(kw, (num_caps, delta_d, delta_d),
                                minval=-bound, maxval=bound, dtype=jnp.float32)
    b_caps = jax.random.uniform(kb, (num_caps, delta_d),
                                minval=-bound, maxval=bound, dtype=jnp.float32)
    w_blockdiag = jax.scipy.linalg.block_diag(*[w_caps[i] for i in range(num_caps)])
    bias = b_caps.reshape(dim)

    ref = _reference(x, neighbors, w_blockdiag, bias, num_caps)

    # f32 MXU operands (tight tolerance); small tiles -> grid (3, 3), multi-step accumulator.
    out_f32 = gcn_layer_forward(x, neighbors, w_blockdiag, bias, num_caps,
                                tile_i=128, tile_j=128, compute_dtype=jnp.float32)
    out_f32 = jax.block_until_ready(out_f32)
    np.testing.assert_allclose(np.asarray(out_f32), np.asarray(ref), rtol=1e-4, atol=1e-4)

    # bf16 MXU operands (fast default path, default tile sizing); looser bf16 tolerance.
    out_bf16 = gcn_layer_forward(x, neighbors, w_blockdiag, bias, num_caps)
    out_bf16 = jax.block_until_ready(out_bf16)
    np.testing.assert_allclose(np.asarray(out_bf16), np.asarray(ref), rtol=3e-2, atol=3e-2)

    print("KERNEL_OK")
</pallas_src>

<mosaic_0001>
module attributes {stable_mosaic.version = 11 : i64} {
  func.func @_gcn_kernel(%arg0: i32, %arg1: i32, %arg2: memref<8x128xi32, #tpu.memory_space<vmem>>, %arg3: memref<32x128xf32, #tpu.memory_space<vmem>>, %arg4: memref<32x32xf32, #tpu.memory_space<vmem>>, %arg5: memref<32x1xf32, #tpu.memory_space<vmem>>, %arg6: memref<32x128xf32, #tpu.memory_space<vmem>>) attributes {dimension_semantics = [#tpu.dimension_semantics<parallel>, #tpu.dimension_semantics<arbitrary>], iteration_bounds = array<i64: 3, 3>, scalar_prefetch = 0 : i64, scratch_operands = 0 : i64, tpu.core_type = #tpu.core_type<tc>, window_params = [{transform_indices = @transform_0, window_bounds = array<i64: 8, 128>}, {transform_indices = @transform_1, window_bounds = array<i64: 32, 128>}, {pipeline_mode = #tpu.pipeline_mode<synchronous>, transform_indices = @transform_2, window_bounds = array<i64: 32, 32>}, {pipeline_mode = #tpu.pipeline_mode<synchronous>, transform_indices = @transform_3, window_bounds = array<i64: 32, 1>}, {transform_indices = @transform_4, window_bounds = array<i64: 32, 128>}]} {
    %c0_i32 = arith.constant 0 : i32
    %0 = arith.cmpi eq, %arg1, %c0_i32 : i32
    %1 = arith.extui %0 : i1 to i32
    %c0_i32_0 = arith.constant 0 : i32
    %2 = arith.cmpi ne, %1, %c0_i32_0 : i32
    scf.if %2 {
      %cst_10 = arith.constant 0.000000e+00 : f32
      %58 = vector.broadcast %cst_10 : f32 to vector<32x128xf32>
      %c0_11 = arith.constant 0 : index
      %c0_12 = arith.constant 0 : index
      %59 = vector.load %arg6[%c0_11, %c0_12] : memref<32x128xf32, #tpu.memory_space<vmem>>, vector<32x128xf32>
      tpu.vector_store %arg6[%c0_11, %c0_12], %58 {strides = array<i32>} : memref<32x128xf32, #tpu.memory_space<vmem>>, vector<32x128xf32>,
    } else {
    }
    %c0 = arith.constant 0 : index
    %c0_1 = arith.constant 0 : index
    %3 = vector.load %arg2[%c0, %c0_1] : memref<8x128xi32, #tpu.memory_space<vmem>>, vector<8x128xi32>
    %c128_i32 = arith.constant 128 : i32
    %4 = arith.muli %arg1, %c128_i32 : i32
    %5 = vector.broadcast %4 : i32 to vector<8x128xi32>
    %6 = arith.subi %3, %5 : vector<8x128xi32>
    %7 = tpu.iota {dimensions = array<i32: 0>} : vector<128x128xi32>
    %c0_i32_2 = arith.constant 0 : i32
    %8 = vector.broadcast %c0_i32_2 : i32 to vector<128x128xi32>
    %9 = vector.extract_strided_slice %6 {offsets = [0, 0], sizes = [1, 128], strides = [1, 1]} : vector<8x128xi32> to vector<1x128xi32>
    %10 = vector.broadcast %9 : vector<1x128xi32> to vector<128x128xi32>
    %11 = arith.cmpi eq, %10, %7 : vector<128x128xi32>
    %12 = arith.extui %11 : vector<128x128xi1> to vector<128x128xi32>
    %13 = arith.addi %8, %12 : vector<128x128xi32>
    %14 = vector.extract_strided_slice %6 {offsets = [1, 0], sizes = [1, 128], strides = [1, 1]} : vector<8x128xi32> to vector<1x128xi32>
    %15 = vector.broadcast %14 : vector<1x128xi32> to vector<128x128xi32>
    %16 = arith.cmpi eq, %15, %7 : vector<128x128xi32>
    %17 = arith.extui %16 : vector<128x128xi1> to vector<128x128xi32>
    %18 = arith.addi %13, %17 : vector<128x128xi32>
    %19 = vector.extract_strided_slice %6 {offsets = [2, 0], sizes = [1, 128], strides = [1, 1]} : vector<8x128xi32> to vector<1x128xi32>
    %20 = vector.broadcast %19 : vector<1x128xi32> to vector<128x128xi32>
    %21 = arith.cmpi eq, %20, %7 : vector<128x128xi32>
    %22 = arith.extui %21 : vector<128x128xi1> to vector<128x128xi32>
    %23 = arith.addi %18, %22 : vector<128x128xi32>
    %24 = vector.extract_strided_slice %6 {offsets = [3, 0], sizes = [1, 128], strides = [1, 1]} : vector<8x128xi32> to vector<1x128xi32>
    %25 = vector.broadcast %24 : vector<1x128xi32> to vector<128x128xi32>
    %26 = arith.cmpi eq, %25, %7 : vector<128x128xi32>
    %27 = arith.extui %26 : vector<128x128xi1> to vector<128x128xi32>
    %28 = arith.addi %23, %27 : vector<128x128xi32>
    %29 = vector.extract_strided_slice %6 {offsets = [4, 0], sizes = [1, 128], strides = [1, 1]} : vector<8x128xi32> to vector<1x128xi32>
    %30 = vector.broadcast %29 : vector<1x128xi32> to vector<128x128xi32>
    %31 = arith.cmpi eq, %30, %7 : vector<128x128xi32>
    %32 = arith.extui %31 : vector<128x128xi1> to vector<128x128xi32>
    %33 = arith.addi %28, %32 : vector<128x128xi32>
    %34 = vector.extract_strided_slice %6 {offsets = [5, 0], sizes = [1, 128], strides = [1, 1]} : vector<8x128xi32> to vector<1x128xi32>
    %35 = vector.broadcast %34 : vector<1x128xi32> to vector<128x128xi32>
    %36 = arith.cmpi eq, %35, %7 : vector<128x128xi32>
    %37 = arith.extui %36 : vector<128x128xi1> to vector<128x128xi32>
    %38 = arith.addi %33, %37 : vector<128x128xi32>
    %39 = vector.extract_strided_slice %6 {offsets = [6, 0], sizes = [1, 128], strides = [1, 1]} : vector<8x128xi32> to vector<1x128xi32>
    %40 = vector.broadcast %39 : vector<1x128xi32> to vector<128x128xi32>
    %41 = arith.cmpi eq, %40, %7 : vector<128x128xi32>
    %42 = arith.extui %41 : vector<128x128xi1> to vector<128x128xi32>
    %43 = arith.addi %38, %42 : vector<128x128xi32>
    %44 = vector.extract_strided_slice %6 {offsets = [7, 0], sizes = [1, 128], strides = [1, 1]} : vector<8x128xi32> to vector<1x128xi32>
    %45 = vector.broadcast %44 : vector<1x128xi32> to vector<128x128xi32>
    %46 = arith.cmpi eq, %45, %7 : vector<128x128xi32>
    %47 = arith.extui %46 : vector<128x128xi1> to vector<128x128xi32>
    %48 = arith.addi %43, %47 : vector<128x128xi32>
    %c0_3 = arith.constant 0 : index
    %c0_4 = arith.constant 0 : index
    %49 = vector.load %arg6[%c0_3, %c0_4] : memref<32x128xf32, #tpu.memory_space<vmem>>, vector<32x128xf32>
    %c0_5 = arith.constant 0 : index
    %c0_6 = arith.constant 0 : index
    %50 = vector.load %arg3[%c0_5, %c0_6] : memref<32x128xf32, #tpu.memory_space<vmem>>, vector<32x128xf32>
    %51 = arith.sitofp %48 : vector<128x128xi32> to vector<128x128xf32>
    %cst = arith.constant dense<0.000000e+00> : vector<32x128xf32>
    %52 = tpu.matmul %50, %51, %cst {dimension_numbers = #tpu.dot_dimension_numbers<[1], [0], [0], [1], [0, 0, 1, 1], [], []>} : vector<32x128xf32>, vector<128x128xf32>, vector<32x128xf32> -> vector<32x128xf32>
    %53 = arith.addf %49, %52 : vector<32x128xf32>
    %c0_7 = arith.constant 0 : index
    %c0_8 = arith.constant 0 : index
    %54 = vector.load %arg6[%c0_7, %c0_8] : memref<32x128xf32, #tpu.memory_space<vmem>>, vector<32x128xf32>
    tpu.vector_store %arg6[%c0_7, %c0_8], %53 {strides = array<i32>} : memref<32x128xf32, #tpu.memory_space<vmem>>, vector<32x128xf32>,
    %c2_i32 = arith.constant 2 : i32
    %55 = arith.cmpi eq, %arg1, %c2_i32 : i32
    %56 = arith.extui %55 : i1 to i32
    %c0_i32_9 = arith.constant 0 : i32
    %57 = arith.cmpi ne, %56, %c0_i32_9 : i32
    scf.if %57 {
      %c0_10 = arith.constant 0 : index
      %c0_11 = arith.constant 0 : index
      %58 = vector.load %arg6[%c0_10, %c0_11] : memref<32x128xf32, #tpu.memory_space<vmem>>, vector<32x128xf32>
      %c0_12 = arith.constant 0 : index
      %c0_13 = arith.constant 0 : index
      %59 = vector.load %arg4[%c0_12, %c0_13] : memref<32x32xf32, #tpu.memory_space<vmem>>, vector<32x32xf32>
      %cst_14 = arith.constant dense<0.000000e+00> : vector<32x128xf32>
      %60 = tpu.matmul %59, %58, %cst_14 {dimension_numbers = #tpu.dot_dimension_numbers<[1], [0], [0], [1], [0, 0, 1, 1], [], []>} : vector<32x32xf32>, vector<32x128xf32>, vector<32x128xf32> -> vector<32x128xf32>
      %c0_15 = arith.constant 0 : index
      %c0_16 = arith.constant 0 : index
      %61 = vector.load %arg5[%c0_15, %c0_16] : memref<32x1xf32, #tpu.memory_space<vmem>>, vector<32x1xf32>
      %62 = vector.broadcast %61 : vector<32x1xf32> to vector<32x128xf32>
      %63 = arith.addf %60, %62 : vector<32x128xf32>
      %c0_17 = arith.constant 0 : index
      %c0_18 = arith.constant 0 : index
      %64 = vector.load %arg6[%c0_17, %c0_18] : memref<32x128xf32, #tpu.memory_space<vmem>>, vector<32x128xf32>
      tpu.vector_store %arg6[%c0_17, %c0_18], %63 {strides = array<i32>} : memref<32x128xf32, #tpu.memory_space<vmem>>, vector<32x128xf32>,
    } else {
    }
    return
  }
  func.func @transform_0(%arg0: i32, %arg1: i32) -> (i32, i32) {
    %c0_i32 = arith.constant 0 : i32
    %c0_i32_0 = arith.constant 0 : i32
    return %c0_i32, %arg0 : i32, i32
  }
  func.func @transform_1(%arg0: i32, %arg1: i32) -> (i32, i32) {
    %c0_i32 = arith.constant 0 : i32
    %c0_i32_0 = arith.constant 0 : i32
    return %c0_i32, %arg1 : i32, i32
  }
  func.func @transform_2(%arg0: i32, %arg1: i32) -> (i32, i32) {
    %c0_i32 = arith.constant 0 : i32
    %c0_i32_0 = arith.constant 0 : i32
    %c0_i32_1 = arith.constant 0 : i32
    return %c0_i32, %c0_i32_0 : i32, i32
  }
  func.func @transform_3(%arg0: i32, %arg1: i32) -> (i32, i32) {
    %c0_i32 = arith.constant 0 : i32
    %c0_i32_0 = arith.constant 0 : i32
    %c0_i32_1 = arith.constant 0 : i32
    return %c0_i32, %c0_i32_0 : i32, i32
  }
  func.func @transform_4(%arg0: i32, %arg1: i32) -> (i32, i32) {
    %c0_i32 = arith.constant 0 : i32
    %c0_i32_0 = arith.constant 0 : i32
    return %c0_i32, %arg0 : i32, i32
  }
}

</mosaic_0001>

<bundles_post_ra>
// kernel: tpu_custom_call.1
= control target key start
LH: loop header
LB: loop body
LE: loop exit
PB: predicated region body
PF: predicated region fallthrough
CT: control target
= control target key end

     0   :  { %s2350_s0 = inlined_call_operand.hbm [shape: s32[8,384], index: 0, kind: input, shape index: {}]   ;;  %s2351_s1 = inlined_call_operand.hbm [shape: f32[32,384], index: 1, kind: input, shape index: {}]   ;;  %s2352_s2 = inlined_call_operand.vmem [shape: f32[32,32], index: 2, kind: input, shape index: {}]   ;;  %s2353_s3 = inlined_call_operand.vmem [shape: f32[32,1], index: 3, kind: input, shape index: {}]   ;;  %s2354_s4 = inlined_call_operand.hbm [shape: f32[32,384], index: 4, kind: output, shape index: {}]  }
   0x1   :  { %2363 = sst [smem:[#allocation16_spill]] %s2350_s0 }
   0x2   :  { %9 = vsyncpa [#allocation3], 0 }
   0x3   :  { %11 = vsyncpa [#allocation3 + $0x1], 0 }
   0x4   :  { %12 = vsyncpa [#allocation6], 0 }
   0x5   :  { %14 = vsyncpa [#allocation6 + $0x1], 0 }
   0x6   :  { %15 = vsyncpa [#allocation4], 0 }
   0x7   :  { %17 = vsyncpa [#allocation4 + $0x1], 0  ;;  %s1574_s15 = smov 0   ;;  %s1576_s16 = smov 0  }
   0x8   :  { %s1578_s17 = smov 0   ;;  %s1580_s18 = smov 0  }
   0x9   :  { %s1582_s19 = smov 0   ;;  %s1584_s20 = smov 0  }
   0xa   :  { %s1586_s21 = smov 0   ;;  %s1588_s22 = smov 0  }
   0xb   :  { %s1590_s23 = smov 0   ;;  %s1592_s24 = smov 0  }
   0xc   :  { %s1594_s25 = smov 0  }
   0xd LB: > { %2364 = sst [smem:[#allocation11_spill]] %s1527_s23  ;;  %s1068_s26 = sadd.s32 4294967295, %s1535_s25   ;;  %s1535_s25 = sphi %s1594_s25, %s23_s25   ;;  %s1531_s24 = sphi %s1592_s24, %s2390_s24   ;;  %s1527_s23 = sphi %s1590_s23, %s2389_s23   ;;  %s1523_s22 = sphi %s1588_s22, %s2388_s22   ;;  %s1519_s21 = sphi %s1586_s21, %s2387_s21   ;;  %s1515_s20 = sphi %s1584_s20, %s2396_s20   ;;  %s1511_s19 = sphi %s1582_s19, %s2395_s19   ;;  %s1507_s18 = sphi %s1580_s18, %s2394_s18   ;;  %s1503_s17 = sphi %s1578_s17, %s2393_s17   ;;  %s1499_s16 = sphi %s1576_s16, %s2392_s16   ;;  %s1495_s15 = sphi %s1574_s15, %s2391_s15  }
   0xe   : > { %2365 = sst [smem:[#allocation12_spill]] %s1531_s24  ;;  %s1069_s27 = sadd.s32 4294967294, %s1535_s25  }
   0xf   : > { %s32_s28 = sadd.s32 1, %s1527_s23  ;;  %s35_s29 = sadd.s32 1, %s1531_s24 }
  0x10   : > { %p33_p0 = scmp.ge.s32.totalorder %s32_s28, 3  ;;  %s42_s30 = sadd.s32 1, %s1515_s20 }
  0x11   : > { %p49_p1 = scmp.ne.s32.totalorder %s1515_s20, %s1511_s19  ;;  %p50_p2 = scmp.eq.s32.totalorder %s1535_s25, 0 }
  0x12   : > { %s2398_s28 = smov (%p33_p0, %s32_s28), 0  ;;  %s2400_s29 = smov (!%p33_p0, %s35_s29), %s1531_s24 }
  0x13   : > { %2366 = sst [smem:[#allocation13_spill]] %s2398_s28  ;;  %p1645_p3 = por %p50_p2, %p49_p1 }
  0x14   : > { %p2355_p4 = scmp.ne.s32.totalorder %s1511_s19, %s1507_s18  ;;  %p37_p5 = scmp.ge.s32.totalorder %s2400_s29, 3 }
  0x15   : > { %p1651_p6 = scmp.eq.s32.totalorder %s1068_s26, 0  ;;  %s65_s7 = ssub.s32 %s1527_s23, %s2398_s28 }
  0x16   : > { %s68_s8 = sadd.s32 1, %s1503_s17  ;;  %s2402_s29 = smov (%p37_p5, %s2400_s29), 0 }
  0x17   : > { %2369 = sst [smem:[#allocation14_spill]] %s2402_s29  ;;  %p1665_p7 = por %p1651_p6, %p2355_p4 }
  0x18   : > { %p66_p8 = scmp.eq.s32.totalorder %s65_s7, 0  ;;  %s39_s10 = ssub.s32 %s1531_s24, %s2402_s29 }
  0x19   : > { %s2370_s9 = scalar_select %p1665_p7, 1, 0 }
  0x1a   : > { %p75_p9 = scmp.ne.s32.totalorder %s1503_s17, %s1499_s16  ;;  %p40_p10 = scmp.eq.s32.totalorder %s39_s10, 0 }
  0x1b   : > { %p81_p11 = scmp.ne.s32.totalorder %s1499_s16, %s1495_s15  ;;  %p147_p0 = scmp.eq.s32.totalorder %s1068_s26, 8 }
  0x1c   : > { %s1676_s11 = scalar_select %p66_p8, %s1503_s17, %s68_s8  }
  0x1d   : > { %s1679_s12 = scalar_select %p40_p10, %s1515_s20, %s42_s30  }
  0x1e   : > { %p1683_p12 = por %p75_p9, %p50_p2  ;;  %p1689_p13 = por %p81_p11, %p1651_p6 }
  0x1f   : > { %2371 = sst [smem:[#allocation15_spill]] %s1679_s12  ;;  %p153_p5 = scmp.eq.s32.totalorder %s1069_s27, 8 }
  0x20   : > { %s2373_s14 = scalar_select %p1689_p13, 1, 0 }
  0x21   : > { %p1248_p4 = scmp.lt.s32.totalorder %s1535_s25, 9  ;;  %p1697_p8 = por %p147_p0, %p49_p1 }
  0x22   : > { %p2375_p10 = scmp.ne.s32.totalorder %s1511_s19, %s1507_s18  ;;  %s179_s6 = sand.u32 1, %s1515_s20  }
  0x23   : > { %s2374_s15 = scalar_select %p1697_p8, 1, 0 }
  0x24   : > { %p1704_p2 = por %p153_p5, %p2375_p10  ;;  %s1073_s7 = sshll.u32 %s1531_s24, 7 }
  0x25   : > { %s1072_s8 = sshll.u32 %s179_s6, 3  ;;  %s2377_s0 = sld [smem:[#allocation16_spill]] }
  0x26   : > { %s2376_s30 = scalar_select %p1704_p2, 1, 0 }
  0x27   : > { %s183_s26 = scalar_lea.vmem [#allocation2], %s1072_s8  ;;  %p1717_p1 = pnand %p1248_p4, %p1645_p3 }
  0x28   : > { %s190_s27 = sshll.u32 %s183_s26, 4  ;;  %p1725_p6 = pnand %p1248_p4, %p1683_p12  ;;  %s1721_s27 = int_to_ptr.vmem [resolvable:$true] %s190_s27 }
  0x29   : > { %p1351_p0 = pneg %p1717_p1 }
  0x2b   : > { %s1713_s28 = scalar_lea.hbm %s2377_s0, %s1073_s7  ;;  %s180_s7 = scalar_lea.sflag [#allocation3], %s179_s6 }
  0x2c   : > { %s1349_s10 = scalar_lea.hbm %s1713_s28, 128  ;;  %s1354_s26 = scalar_lea.hbm %s2377_s0, 384 }
  0x2d   : > { %p1350_p11 = scmp.ne.s32.totalorder %s1713_s28, %s1349_s10  ;;  %p1355_p4 = scmp.lt.u32.totalorder %s1713_s28, %s2377_s0 }
  0x2e   : > { %p1356_p12 = scmp.lt.u32.totalorder %s1354_s26, %s1349_s10  ;;  %p1358_p9 = scmp.lt.u32.totalorder %s1349_s10, %s1713_s28 }
  0x2f   : > { %p1352_p3 = pnand %p1351_p0, %p1350_p11 }
  0x30   : > { %p1357_p10 = por %p1356_p12, %p1355_p4 }
  0x31   : > { %p1353_p5 = pneg %p1352_p3 }
  0x32   : > { %p1359_p2 = por %p1358_p9, %p1357_p10 }
  0x34   : > { %p1360_p8 = pnand %p1359_p2, %p1353_p5 }
  0x36   : > { %1363 = shalt.err (!%p1360_p8)
}
  0x37   : > { %s1364_s6 = scalar_lea.vmem %s1721_s27, 128  ;;  %s1537_s5 = smov [#allocation2]  }
  0x38   : > { %p1365_p11 = scmp.ne.s32.totalorder %s1721_s27, %s1364_s6  ;;  %s1369_s8 = sshll.u32 %s1537_s5, 4  ;;  %s1370_s8 = int_to_ptr.vmem [resolvable:$false] %s1369_s8 }
  0x39   : > { %s1371_s24 = scalar_lea.vmem %s1370_s8, 256  ;;  %p1372_p7 = scmp.lt.s32.totalorder %s1721_s27, %s1370_s8 }
  0x3a   : > { %p1367_p3 = pnand %p1365_p11, %p1351_p0  ;;  %p1373_p4 = scmp.lt.s32.totalorder %s1371_s24, %s1364_s6 }
  0x3c   : > { %p1368_p13 = pneg %p1367_p3  ;;  %p1374_p12 = por %p1373_p4, %p1372_p7 }
  0x3e   : > { %p1375_p9 = pnand %p1374_p12, %p1368_p13 }
  0x40   : > { %1378 = shalt.err (!%p1375_p9)
}
  0x41   : > { %1240 = dma.hbm_to_vmem [thread:$0]  (!%p1717_p1), %s1713_s28, 128, %s1721_s27, %s180_s7  }
  0x42   : > { %p215_p8 = scmp.lt.s32.totalorder %s1535_s25, 10  ;;  %s197_s10 = sand.u32 1, %s1503_s17  }
  0x43   : > { %s1075_s26 = sshll.u32 %s1527_s23, 7  ;;  %p2380_p2 = scmp.ge.s32.totalorder %s1535_s25, 1 }
  0x44   : > { %s1074_s6 = sshll.u32 %s197_s10, 5  ;;  %s1767_s8 = scalar_lea.hbm %s2351_s1, %s1075_s26 }
  0x45   : > { %p1760_p0 = pnand %p2380_p2, %p215_p8  ;;  %s201_s24 = scalar_lea.vmem [#allocation5], %s1074_s6 }
  0x46   : > { %s207_s28 = sshll.u32 %s201_s24, 4  ;;  %s1771_s27 = scalar_lea.sflag [#allocation6], %s197_s10  ;;  %s1769_s28 = int_to_ptr.vmem [resolvable:$true] %s207_s28 }
  0x47   : > { %s1379_s7 = scalar_lea.hbm %s1767_s8, 512  ;;  %p1381_p13 = pneg %p1725_p6 }
  0x48   : > { %p1380_p7 = scmp.ne.s32.totalorder %s1767_s8, %s1379_s7  ;;  %s1384_s12 = scalar_lea.hbm %s2351_s1, 1536 }
  0x49   : > { %p1385_p10 = scmp.lt.u32.totalorder %s1767_s8, %s2351_s1  ;;  %p1386_p11 = scmp.lt.u32.totalorder %s1384_s12, %s1379_s7 }
  0x4a   : > { %p1382_p1 = pnand %p1381_p13, %p1380_p7  ;;  %p1388_p4 = scmp.lt.u32.totalorder %s1379_s7, %s1767_s8 }
  0x4b   : > { %p1387_p3 = por %p1386_p11, %p1385_p10 }
  0x4c   : > { %p1383_p5 = pneg %p1382_p1 }
  0x4d   : > { %p1389_p12 = por %p1388_p4, %p1387_p3 }
  0x4f   : > { %p1390_p9 = pnand %p1389_p12, %p1383_p5 }
  0x51   : > { %1393 = shalt.err (!%p1390_p9)
}
  0x52   : > { %s1394_s10 = scalar_lea.vmem %s1769_s28, 512  ;;  %s1538_s6 = smov [#allocation5]  }
  0x53   : > { %p1395_p8 = scmp.ne.s32.totalorder %s1769_s28, %s1394_s10  ;;  %s1399_s24 = sshll.u32 %s1538_s6, 4  ;;  %s1400_s24 = int_to_ptr.vmem [resolvable:$false] %s1399_s24 }
  0x54   : > { %s1401_s0 = scalar_lea.vmem %s1400_s24, 1024  ;;  %p1402_p1 = scmp.lt.s32.totalorder %s1769_s28, %s1400_s24 }
  0x55   : > { %p1397_p2 = pnand %p1395_p8, %p1381_p13  ;;  %p1403_p10 = scmp.lt.s32.totalorder %s1401_s0, %s1394_s10 }
  0x57   : > { %p1398_p7 = pneg %p1397_p2  ;;  %p1404_p11 = por %p1403_p10, %p1402_p1 }
  0x59   : > { %p1405_p3 = pnand %p1404_p11, %p1398_p7 }
  0x5b   : > { %1408 = shalt.err (!%p1405_p3)
}
  0x5c   : > { %s1539_s23 = smov 384   ;;  %s1540_s7 = smov 128  }
  0x5d   : > { %s1541_s26 = smov 8   ;;  %219 = sbr.rel (%p1760_p0) target bundleno = 712 (0x2c8), region = 36 }
  0x5e   : > { %1243 = dma.hbm_to_vmem [thread:$0]  (!%p1725_p6), %s1767_s8, 512, %s1769_s28, %s1771_s27, %s1539_s23, %s1540_s7, %s1541_s26  }
  0x5f   : > { %s1802_s5 = sand.u32 (!%p1760_p0), 1, %s1511_s19   ;;  %p2382_p13 = scmp.ne.s32.totalorder (!%p1760_p0), %s2370_s9, 0 }
  0x60   : > { %s1077_s12 = sshll.u32 (!%p1760_p0), %s1802_s5, 3  ;;  %s222_s10 = scalar_lea.sflag (!%p1760_p0), [#allocation3], %s1802_s5 }
  0x61   : > { %s225_s6 = scalar_lea.vmem (!%p1760_p0), [#allocation2], %s1077_s12 }
  0x64   : > { %1482 = dma.done.wait (%p2382_p13), %s222_s10, 128  }
  0x65   : > { %1484 = vsyncadd (%p2382_p13), %s222_s10, 4294967168  ;;  %s230_s29 = sand.u32 1, %s1499_s16   ;;  %p2383_p6 = scmp.ne.s32.totalorder %s2373_s14, 0 }
  0x66   : > { %s1078_s8 = sshll.u32 %s230_s29, 5  ;;  %s231_s13 = scalar_lea.sflag [#allocation6], %s230_s29 }
  0x67   : > { %s1811_s28 = scalar_lea.vmem [#allocation5], %s1078_s8 }
  0x68   : > { %1486 = dma.done.wait (%p2383_p6), %s231_s13, 512  }
  0x69   : > { %1488 = vsyncadd (%p2383_p6), %s231_s13, 4294966784  ;;  %s1079_s27 = sshll.u32 %s1802_s5, 5  ;;  %p1080_p0 = scmp.ne.s32.totalorder %s1519_s21, 0 }
  0x6a   : > { %s1818_s24 = scalar_lea.vmem [#allocation7], %s1079_s27  ;;  %v1542_v0 = vmov (!%p1080_p0), 0.0  }
  0x6b   : > { %267 = sbr.rel (%p1080_p0) target bundleno = 114 (0x72), region = 48  ;;  %268 = vst [vmem:[%s1818_s24] sm:$0xff] (!%p1080_p0), %v1542_v0  ;;  %269 = vst [vmem:[%s1818_s24 + $0x8] sm:$0xff] (!%p1080_p0), %v1542_v0 }
  0x6c   : > { %270 = vst [vmem:[%s1818_s24 + $0x10] sm:$0xff] (!%p1080_p0), %v1542_v0  ;;  %271 = vst [vmem:[%s1818_s24 + $0x18] sm:$0xff] (!%p1080_p0), %v1542_v0 }
  0x72 PF: > { %v272_v1 = vld [vmem:[%s225_s6] sm:$0xff]  ;;  %s1081_s9 = sshll.u32 %s1519_s21, 7  ;;  %v276_v2 = vlaneseq  ;;  %v697_v3 = vld [vmem:[%s1811_s28] sm:$0xff]  ;;  %v1543_v24 = vmov 0   ;;  %p1082_p5 = scmp.ne.s32.totalorder %s1519_s21, 2 }
  0x73   : > { %v699_v4 = vld [vmem:[%s1811_s28 + $0x10] sm:$0xff]  ;;  %v274_v5 = vstv %s1081_s9  ;;  %1151 = vmatprep.mubr.f32.mxu0 %v697_v3 }
  0x74   : > { %1154 = vmatprep.mubr.f32.mxu1 %v699_v4  ;;  %v275_v6 = vsub.s32 %v272_v1, %v274_v5  ;;  %v1828_v7 = vshrl.u32 %v276_v2, 7 }
  0x76   : > { %v1831_v8 = vadd.s32 8, %v1828_v7  ;;  %v295_v9 = vsub.s32 0, %v1828_v7  ;;  %v331_v10 = vsub.s32 1, %v1828_v7  ;;  %v383_v11 = vsub.s32 2, %v1828_v7 }
  0x77   : > { %v435_v12 = vsub.s32 3, %v1828_v7  ;;  %v487_v13 = vsub.s32 4, %v1828_v7  ;;  %v539_v14 = vsub.s32 5, %v1828_v7  ;;  %v591_v15 = vsub.s32 6, %v1828_v7 }
  0x78   : > { %v1840_v16 = vrot.slane %v275_v6, %v295_v9  ;;  %v1842_v17 = vrot.slane %v275_v6, %v331_v10  ;;  %v1844_v18 = vrot.slane %v275_v6, %v383_v11  ;;  %v643_v19 = vsub.s32 7, %v1828_v7 }
  0x79   : > { %v1847_v20 = vrot.slane %v275_v6, %v435_v12  ;;  %v1849_v21 = vrot.slane %v275_v6, %v487_v13  ;;  %v1851_v22 = vrot.slane %v275_v6, %v539_v14  ;;  %v1853_v23 = vrot.slane %v275_v6, %v591_v15 }
  0x7a   : > { %vm297_vm0 = vcmp.eq.s32.totalorder %v1840_v16, %v1828_v7  ;;  %vm298_vm1 = vcmp.eq.s32.totalorder %v1840_v16, %v1831_v8  ;;  %vm333_vm2 = vcmp.eq.s32.totalorder %v1842_v17, %v1828_v7  ;;  %vm334_vm3 = vcmp.eq.s32.totalorder %v1842_v17, %v1831_v8 }
  0x7b   : > { %v313_v25 = vsel %vm297_vm0, 1, %v1543_v24  ;;  %v314_v26 = vsel %vm298_vm1, 1, %v1543_v24  ;;  %v349_v27 = vsel %vm333_vm2, 1, %v1543_v24  ;;  %v350_v28 = vsel %vm334_vm3, 1, %v1543_v24 }
  0x7c   : > { %v365_v29 = vadd.s32 %v349_v27, %v313_v25  ;;  %v366_v30 = vadd.s32 %v350_v28, %v314_v26  ;;  %vm385_vm4 = vcmp.eq.s32.totalorder %v1844_v18, %v1828_v7  ;;  %vm386_vm5 = vcmp.eq.s32.totalorder %v1844_v18, %v1831_v8 }
  0x7d   : > { %v401_v31 = vsel %vm385_vm4, 1, %v1543_v24  ;;  %v402_v32 = vsel %vm386_vm5, 1, %v1543_v24  ;;  %vm437_vm6 = vcmp.eq.s32.totalorder %v1847_v20, %v1828_v7  ;;  %vm438_vm7 = vcmp.eq.s32.totalorder %v1847_v20, %v1831_v8 }
  0x7e   : > { %v417_v33 = vadd.s32 %v401_v31, %v365_v29  ;;  %v418_v34 = vadd.s32 %v402_v32, %v366_v30  ;;  %v453_v35 = vsel %vm437_vm6, 1, %v1543_v24  ;;  %v454_v36 = vsel %vm438_vm7, 1, %v1543_v24 }
  0x7f   : > { %vm489_vm8 = vcmp.eq.s32.totalorder %v1849_v21, %v1828_v7  ;;  %vm490_vm9 = vcmp.eq.s32.totalorder %v1849_v21, %v1831_v8  ;;  %vm541_vm10 = vcmp.eq.s32.totalorder %v1851_v22, %v1828_v7  ;;  %vm542_vm11 = vcmp.eq.s32.totalorder %v1851_v22, %v1831_v8 }
  0x80   : > { %v469_v37 = vadd.s32 %v453_v35, %v417_v33  ;;  %v470_v38 = vadd.s32 %v454_v36, %v418_v34  ;;  %v505_v39 = vsel %vm489_vm8, 1, %v1543_v24  ;;  %v506_v40 = vsel %vm490_vm9, 1, %v1543_v24 }
  0x81   : > { %v557_v41 = vsel %vm541_vm10, 1, %v1543_v24  ;;  %v558_v42 = vsel %vm542_vm11, 1, %v1543_v24  ;;  %vm593_vm12 = vcmp.eq.s32.totalorder %v1853_v23, %v1828_v7  ;;  %vm594_vm13 = vcmp.eq.s32.totalorder %v1853_v23, %v1831_v8 }
  0x82   : > { %v521_v43 = vadd.s32 %v505_v39, %v469_v37  ;;  %v522_v44 = vadd.s32 %v506_v40, %v470_v38  ;;  %v609_v45 = vsel %vm593_vm12, 1, %v1543_v24  ;;  %v610_v46 = vsel %vm594_vm13, 1, %v1543_v24 }
  0x83   : > { %v1897_v47 = vrot.slane %v275_v6, %v643_v19  ;;  %v1900_v48 = vadd.s32 16, %v1828_v7  ;;  %v1903_v49 = vadd.s32 24, %v1828_v7  ;;  %v1906_v50 = vadd.s32 32, %v1828_v7 }
  0x84   : > { %v573_v51 = vadd.s32 %v557_v41, %v521_v43  ;;  %v574_v52 = vadd.s32 %v558_v42, %v522_v44  ;;  %v1909_v53 = vadd.s32 40, %v1828_v7  ;;  %v1912_v54 = vadd.s32 48, %v1828_v7 }
  0x85   : > { %vm645_vm14 = vcmp.eq.s32.totalorder %v1897_v47, %v1828_v7  ;;  %vm646_vm15 = vcmp.eq.s32.totalorder %v1897_v47, %v1831_v8  ;;  %vm299_vm0 = vcmp.eq.s32.totalorder %v1840_v16, %v1900_v48  ;;  %vm300_vm1 = vcmp.eq.s32.totalorder %v1840_v16, %v1903_v49 }
  0x86   : > { %v625_v55 = vadd.s32 %v609_v45, %v573_v51  ;;  %v626_v56 = vadd.s32 %v610_v46, %v574_v52  ;;  %v661_v57 = vsel %vm645_vm14, 1, %v1543_v24  ;;  %v662_v58 = vsel %vm646_vm15, 1, %v1543_v24 }
  0x87   : > { %v315_v59 = vsel %vm299_vm0, 1, %v1543_v24  ;;  %v316_v60 = vsel %vm300_vm1, 1, %v1543_v24  ;;  %vm335_vm2 = vcmp.eq.s32.totalorder %v1842_v17, %v1900_v48  ;;  %vm336_vm3 = vcmp.eq.s32.totalorder %v1842_v17, %v1903_v49 }
  0x88   : > { %v677_v61 = vadd.s32 %v661_v57, %v625_v55  ;;  %v678_v62 = vadd.s32 %v662_v58, %v626_v56  ;;  %v351_v63 = vsel %vm335_vm2, 1, %v1543_v24  ;;  %v352_v0 = vsel %vm336_vm3, 1, %v1543_v24 }
  0x89   : > { %v367_v1 = vadd.s32 %v351_v63, %v315_v59  ;;  %v368_v2 = vadd.s32 %v352_v0, %v316_v60  ;;  %vm387_vm4 = vcmp.eq.s32.totalorder %v1844_v18, %v1900_v48  ;;  %vm388_vm5 = vcmp.eq.s32.totalorder %v1844_v18, %v1903_v49 }
  0x8a   : > { %v701_v3 = vcvt.s32.f32 %v677_v61  ;;  %v702_v4 = vcvt.s32.f32 %v678_v62  ;;  %v403_v5 = vsel %vm387_vm4, 1, %v1543_v24  ;;  %v404_v6 = vsel %vm388_vm5, 1, %v1543_v24 }
  0x8b   : > { %v419_v8 = vadd.s32 %v403_v5, %v367_v1  ;;  %v420_v9 = vadd.s32 %v404_v6, %v368_v2  ;;  %vm439_vm6 = vcmp.eq.s32.totalorder %v1847_v20, %v1900_v48  ;;  %vm440_vm7 = vcmp.eq.s32.totalorder %v1847_v20, %v1903_v49 }
  0x8c   : > { %v1171_v10 = vpack.c.bf16 %v702_v4, %v701_v3  ;;  %v455_v11 = vsel %vm439_vm6, 1, %v1543_v24  ;;  %v456_v12 = vsel %vm440_vm7, 1, %v1543_v24  ;;  %vm491_vm8 = vcmp.eq.s32.totalorder %v1849_v21, %v1900_v48 }
  0x8d   : > { %v471_v13 = vadd.s32 %v455_v11, %v419_v8  ;;  %v472_v14 = vadd.s32 %v456_v12, %v420_v9  ;;  %vm492_vm9 = vcmp.eq.s32.totalorder %v1849_v21, %v1903_v49  ;;  %v507_v15 = vsel %vm491_vm8, 1, %v1543_v24 }
  0x8e   : > { %1172 = vmatprep.subr.bf16.mxu0 %v1171_v10  ;;  %1211 = vmatprep.subr.bf16.mxu1 %v1171_v10  ;;  %v508_v19 = vsel %vm492_vm9, 1, %v1543_v24  ;;  %vm543_vm10 = vcmp.eq.s32.totalorder %v1851_v22, %v1900_v48  ;;  %vm544_vm11 = vcmp.eq.s32.totalorder %v1851_v22, %v1903_v49  ;;  %vm595_vm12 = vcmp.eq.s32.totalorder %v1853_v23, %v1900_v48 }
  0x8f   : > { %1174 = vmatpush3.bf16.msra.mxu0 %v1171_v10  ;;  %1219 = vmatpush3.bf16.msra.mxu1 %v1171_v10  ;;  %v523_v25 = vadd.s32 %v507_v15, %v471_v13  ;;  %v524_v26 = vadd.s32 %v508_v19, %v472_v14  ;;  %v559_v27 = vsel %vm543_vm10, 1, %v1543_v24  ;;  %v560_v28 = vsel %vm544_vm11, 1, %v1543_v24 }
  0x90   : > { %vm596_vm13 = vcmp.eq.s32.totalorder %v1853_v23, %v1903_v49  ;;  %v611_v29 = vsel %vm595_vm12, 1, %v1543_v24  ;;  %vm647_vm14 = vcmp.eq.s32.totalorder %v1897_v47, %v1900_v48  ;;  %vm648_vm15 = vcmp.eq.s32.totalorder %v1897_v47, %v1903_v49 }
  0x91   : > { %v575_v30 = vadd.s32 %v559_v27, %v523_v25  ;;  %v576_v31 = vadd.s32 %v560_v28, %v524_v26  ;;  %v612_v32 = vsel %vm596_vm13, 1, %v1543_v24  ;;  %v663_v33 = vsel %vm647_vm14, 1, %v1543_v24 }
  0x92   : > { %v664_v34 = vsel %vm648_vm15, 1, %v1543_v24  ;;  %vm301_vm0 = vcmp.eq.s32.totalorder %v1840_v16, %v1906_v50  ;;  %vm302_vm1 = vcmp.eq.s32.totalorder %v1840_v16, %v1909_v53  ;;  %vm337_vm2 = vcmp.eq.s32.totalorder %v1842_v17, %v1906_v50 }
  0x93   : > { %v627_v35 = vadd.s32 %v611_v29, %v575_v30  ;;  %v628_v36 = vadd.s32 %v612_v32, %v576_v31  ;;  %v317_v37 = vsel %vm301_vm0, 1, %v1543_v24  ;;  %v318_v38 = vsel %vm302_vm1, 1, %v1543_v24 }
  0x94   : > { %vm338_vm3 = vcmp.eq.s32.totalorder %v1842_v17, %v1909_v53  ;;  %v353_v39 = vsel %vm337_vm2, 1, %v1543_v24  ;;  %vm389_vm4 = vcmp.eq.s32.totalorder %v1844_v18, %v1906_v50  ;;  %vm390_vm5 = vcmp.eq.s32.totalorder %v1844_v18, %v1909_v53 }
  0x95   : > { %v679_v40 = vadd.s32 %v663_v33, %v627_v35  ;;  %v680_v41 = vadd.s32 %v664_v34, %v628_v36  ;;  %v354_v42 = vsel %vm338_vm3, 1, %v1543_v24  ;;  %v369_v43 = vadd.s32 %v353_v39, %v317_v37 }
  0x96   : > { %v370_v44 = vadd.s32 %v354_v42, %v318_v38  ;;  %v405_v45 = vsel %vm389_vm4, 1, %v1543_v24  ;;  %v406_v46 = vsel %vm390_vm5, 1, %v1543_v24  ;;  %vm441_vm6 = vcmp.eq.s32.totalorder %v1847_v20, %v1906_v50 }
  0x97   : > { %v703_v48 = vcvt.s32.f32 %v679_v40  ;;  %v704_v49 = vcvt.s32.f32 %v680_v41  ;;  %v421_v51 = vadd.s32 %v405_v45, %v369_v43  ;;  %vm442_vm7 = vcmp.eq.s32.totalorder %v1847_v20, %v1909_v53 }
  0x98   : > { %v422_v52 = vadd.s32 %v406_v46, %v370_v44  ;;  %v457_v55 = vsel %vm441_vm6, 1, %v1543_v24  ;;  %v458_v56 = vsel %vm442_vm7, 1, %v1543_v24  ;;  %vm493_vm8 = vcmp.eq.s32.totalorder %v1849_v21, %v1906_v50 }
  0x99   : > { %v1175_v57 = vpack.c.bf16 %v704_v49, %v703_v48  ;;  %v473_v58 = vadd.s32 %v457_v55, %v421_v51  ;;  %vm494_vm9 = vcmp.eq.s32.totalorder %v1849_v21, %v1909_v53  ;;  %v509_v59 = vsel %vm493_vm8, 1, %v1543_v24 }
  0x9a   : > { %v474_v60 = vadd.s32 %v458_v56, %v422_v52  ;;  %v510_v61 = vsel %vm494_vm9, 1, %v1543_v24  ;;  %vm545_vm10 = vcmp.eq.s32.totalorder %v1851_v22, %v1906_v50  ;;  %vm546_vm11 = vcmp.eq.s32.totalorder %v1851_v22, %v1909_v53 }
  0x9b   : > { %1176 = vmatprep.subr.bf16.mxu0 %v1175_v57  ;;  %1212 = vmatprep.subr.bf16.mxu1 %v1175_v57  ;;  %v525_v62 = vadd.s32 %v509_v59, %v473_v58  ;;  %v561_v63 = vsel %vm545_vm10, 1, %v1543_v24  ;;  %v562_v0 = vsel %vm546_vm11, 1, %v1543_v24  ;;  %vm597_vm12 = vcmp.eq.s32.totalorder %v1853_v23, %v1906_v50 }
  0x9c   : > { %1178 = vmatpush3.bf16.msra.mxu0 %v1175_v57  ;;  %1220 = vmatpush3.bf16.msra.mxu1 %v1175_v57  ;;  %v526_v1 = vadd.s32 %v510_v61, %v474_v60  ;;  %vm598_vm13 = vcmp.eq.s32.totalorder %v1853_v23, %v1909_v53  ;;  %v613_v2 = vsel %vm597_vm12, 1, %v1543_v24  ;;  %vm649_vm14 = vcmp.eq.s32.totalorder %v1897_v47, %v1906_v50 }
  0x9d   : > { %v577_v3 = vadd.s32 %v561_v63, %v525_v62  ;;  %v614_v4 = vsel %vm598_vm13, 1, %v1543_v24  ;;  %vm650_vm15 = vcmp.eq.s32.totalorder %v1897_v47, %v1909_v53  ;;  %v665_v5 = vsel %vm649_vm14, 1, %v1543_v24 }
  0x9e   : > { %v578_v6 = vadd.s32 %v562_v0, %v526_v1  ;;  %v666_v8 = vsel %vm650_vm15, 1, %v1543_v24  ;;  %v284_v9 = vadd.s32 56, %v1828_v7  ;;  %vm303_vm0 = vcmp.eq.s32.totalorder %v1840_v16, %v1912_v54 }
  0x9f   : > { %v629_v10 = vadd.s32 %v613_v2, %v577_v3  ;;  %v319_v11 = vsel %vm303_vm0, 1, %v1543_v24  ;;  %vm339_vm1 = vcmp.eq.s32.totalorder %v1842_v17, %v1912_v54  ;;  %vm391_vm2 = vcmp.eq.s32.totalorder %v1844_v18, %v1912_v54 }
  0xa0   : > { %v630_v50 = vadd.s32 %v614_v4, %v578_v6  ;;  %vm304_vm3 = vcmp.eq.s32.totalorder %v1840_v16, %v284_v9  ;;  %vm340_vm4 = vcmp.eq.s32.totalorder %v1842_v17, %v284_v9  ;;  %v355_v53 = vsel %vm339_vm1, 1, %v1543_v24 }
  0xa1   : > { %v681_v12 = vadd.s32 %v665_v5, %v629_v10  ;;  %v320_v13 = vsel %vm304_vm3, 1, %v1543_v24  ;;  %v356_v14 = vsel %vm340_vm4, 1, %v1543_v24  ;;  %v371_v15 = vadd.s32 %v355_v53, %v319_v11 }
  0xa2   : > { %v682_v19 = vadd.s32 %v666_v8, %v630_v50  ;;  %v372_v25 = vadd.s32 %v356_v14, %v320_v13  ;;  %vm392_vm5 = vcmp.eq.s32.totalorder %v1844_v18, %v284_v9  ;;  %v407_v26 = vsel %vm391_vm2, 1, %v1543_v24 }
  0xa3   : > { %v705_v27 = vcvt.s32.f32 %v681_v12  ;;  %v408_v28 = vsel %vm392_vm5, 1, %v1543_v24  ;;  %v423_v29 = vadd.s32 %v407_v26, %v371_v15  ;;  %vm443_vm6 = vcmp.eq.s32.totalorder %v1847_v20, %v1912_v54 }
  0xa4   : > { %v706_v30 = vcvt.s32.f32 %v682_v19  ;;  %v424_v31 = vadd.s32 %v408_v28, %v372_v25  ;;  %vm444_vm7 = vcmp.eq.s32.totalorder %v1847_v20, %v284_v9  ;;  %v459_v32 = vsel %vm443_vm6, 1, %v1543_v24 }
  0xa5   : > { %v460_v33 = vsel %vm444_vm7, 1, %v1543_v24  ;;  %v475_v34 = vadd.s32 %v459_v32, %v423_v29  ;;  %vm495_vm8 = vcmp.eq.s32.totalorder %v1849_v21, %v1912_v54  ;;  %vm496_vm9 = vcmp.eq.s32.totalorder %v1849_v21, %v284_v9 }
  0xa6   : > { %v1179_v35 = vpack.c.bf16 %v706_v30, %v705_v27  ;;  %v476_v36 = vadd.s32 %v460_v33, %v424_v31  ;;  %v511_v37 = vsel %vm495_vm8, 1, %v1543_v24  ;;  %v512_v38 = vsel %vm496_vm9, 1, %v1543_v24 }
  0xa7   : > { %v527_v39 = vadd.s32 %v511_v37, %v475_v34  ;;  %vm547_vm10 = vcmp.eq.s32.totalorder %v1851_v22, %v1912_v54  ;;  %vm548_vm11 = vcmp.eq.s32.totalorder %v1851_v22, %v284_v9  ;;  %vm599_vm12 = vcmp.eq.s32.totalorder %v1853_v23, %v1912_v54 }
  0xa8   : > { %1180 = vmatprep.subr.bf16.mxu0 %v1179_v35  ;;  %1213 = vmatprep.subr.bf16.mxu1 %v1179_v35  ;;  %v528_v40 = vadd.s32 %v512_v38, %v476_v36  ;;  %v563_v41 = vsel %vm547_vm10, 1, %v1543_v24  ;;  %v564_v42 = vsel %vm548_vm11, 1, %v1543_v24  ;;  %vm600_vm13 = vcmp.eq.s32.totalorder %v1853_v23, %v284_v9 }
  0xa9   : > { %1182 = vmatpush3.bf16.msra.mxu0 %v1179_v35  ;;  %1221 = vmatpush3.bf16.msra.mxu1 %v1179_v35  ;;  %v579_v43 = vadd.s32 %v563_v41, %v527_v39  ;;  %v615_v44 = vsel %vm599_vm12, 1, %v1543_v24  ;;  %v616_v45 = vsel %vm600_vm13, 1, %v1543_v24  ;;  %vm651_vm14 = vcmp.eq.s32.totalorder %v1897_v47, %v1912_v54 }
  0xaa   : > { %v580_v46 = vadd.s32 %v564_v42, %v528_v40  ;;  %vm652_vm15 = vcmp.eq.s32.totalorder %v1897_v47, %v284_v9  ;;  %v667_v48 = vsel %vm651_vm14, 1, %v1543_v24  ;;  %v285_v49 = vadd.s32 64, %v1828_v7 }
  0xab   : > { %v631_v51 = vadd.s32 %v615_v44, %v579_v43  ;;  %v668_v52 = vsel %vm652_vm15, 1, %v1543_v24  ;;  %v286_v55 = vadd.s32 72, %v1828_v7  ;;  %v2060_v56 = vadd.s32 80, %v1828_v7 }
  0xac   : > { %v632_v57 = vadd.s32 %v616_v45, %v580_v46  ;;  %vm305_vm0 = vcmp.eq.s32.totalorder %v1840_v16, %v285_v49  ;;  %vm341_vm1 = vcmp.eq.s32.totalorder %v1842_v17, %v285_v49  ;;  %vm393_vm2 = vcmp.eq.s32.totalorder %v1844_v18, %v285_v49 }
  0xad   : > { %v683_v54 = vadd.s32 %v667_v48, %v631_v51  ;;  %vm306_vm3 = vcmp.eq.s32.totalorder %v1840_v16, %v286_v55  ;;  %v321_v58 = vsel %vm305_vm0, 1, %v1543_v24  ;;  %vm342_vm4 = vcmp.eq.s32.totalorder %v1842_v17, %v286_v55 }
  0xae   : > { %v684_v59 = vadd.s32 %v668_v52, %v632_v57  ;;  %v322_v60 = vsel %vm306_vm3, 1, %v1543_v24  ;;  %v357_v61 = vsel %vm341_vm1, 1, %v1543_v24  ;;  %v358_v62 = vsel %vm342_vm4, 1, %v1543_v24 }
  0xaf   : > { %v707_v63 = vcvt.s32.f32 %v683_v54  ;;  %v373_v0 = vadd.s32 %v357_v61, %v321_v58  ;;  %v374_v1 = vadd.s32 %v358_v62, %v322_v60  ;;  %vm394_vm5 = vcmp.eq.s32.totalorder %v1844_v18, %v286_v55 }
  0xb0   : > { %v708_v2 = vcvt.s32.f32 %v684_v59  ;;  %v409_v3 = vsel %vm393_vm2, 1, %v1543_v24  ;;  %v410_v4 = vsel %vm394_vm5, 1, %v1543_v24  ;;  %vm445_vm6 = vcmp.eq.s32.totalorder %v1847_v20, %v285_v49 }
  0xb1   : > { %v425_v5 = vadd.s32 %v409_v3, %v373_v0  ;;  %v426_v6 = vadd.s32 %v410_v4, %v374_v1  ;;  %vm446_vm7 = vcmp.eq.s32.totalorder %v1847_v20, %v286_v55  ;;  %v461_v8 = vsel %vm445_vm6, 1, %v1543_v24 }
  0xb2   : > { %v1183_v9 = vpack.c.bf16 %v708_v2, %v707_v63  ;;  %v462_v10 = vsel %vm446_vm7, 1, %v1543_v24  ;;  %vm497_vm8 = vcmp.eq.s32.totalorder %v1849_v21, %v285_v49  ;;  %vm498_vm9 = vcmp.eq.s32.totalorder %v1849_v21, %v286_v55 }
  0xb3   : > { %v477_v11 = vadd.s32 %v461_v8, %v425_v5  ;;  %v478_v50 = vadd.s32 %v462_v10, %v426_v6  ;;  %v513_v53 = vsel %vm497_vm8, 1, %v1543_v24  ;;  %v514_v12 = vsel %vm498_vm9, 1, %v1543_v24 }
  0xb4   : > { %1184 = vmatprep.subr.bf16.mxu0 %v1183_v9  ;;  %1214 = vmatprep.subr.bf16.mxu1 %v1183_v9  ;;  %vm549_vm10 = vcmp.eq.s32.totalorder %v1851_v22, %v285_v49  ;;  %vm550_vm11 = vcmp.eq.s32.totalorder %v1851_v22, %v286_v55  ;;  %vm601_vm12 = vcmp.eq.s32.totalorder %v1853_v23, %v285_v49  ;;  %v2086_v13 = vadd.s32 88, %v1828_v7 }
  0xb5   : > { %1186 = vmatpush3.bf16.msra.mxu0 %v1183_v9  ;;  %1222 = vmatpush3.bf16.msra.mxu1 %v1183_v9  ;;  %v529_v14 = vadd.s32 %v513_v53, %v477_v11  ;;  %v530_v15 = vadd.s32 %v514_v12, %v478_v50  ;;  %v565_v19 = vsel %vm549_vm10, 1, %v1543_v24  ;;  %v566_v25 = vsel %vm550_vm11, 1, %v1543_v24 }
  0xb6   : > { %vm602_vm13 = vcmp.eq.s32.totalorder %v1853_v23, %v286_v55  ;;  %v617_v26 = vsel %vm601_vm12, 1, %v1543_v24  ;;  %vm653_vm14 = vcmp.eq.s32.totalorder %v1897_v47, %v285_v49  ;;  %vm654_vm15 = vcmp.eq.s32.totalorder %v1897_v47, %v286_v55 }
  0xb7   : > { %v581_v27 = vadd.s32 %v565_v19, %v529_v14  ;;  %v582_v28 = vadd.s32 %v566_v25, %v530_v15  ;;  %v618_v29 = vsel %vm602_vm13, 1, %v1543_v24  ;;  %v669_v30 = vsel %vm653_vm14, 1, %v1543_v24 }
  0xb8   : > { %v670_v31 = vsel %vm654_vm15, 1, %v1543_v24  ;;  %vm307_vm0 = vcmp.eq.s32.totalorder %v1840_v16, %v2060_v56  ;;  %vm308_vm1 = vcmp.eq.s32.totalorder %v1840_v16, %v2086_v13  ;;  %vm343_vm2 = vcmp.eq.s32.totalorder %v1842_v17, %v2060_v56 }
  0xb9   : > { %v633_v32 = vadd.s32 %v617_v26, %v581_v27  ;;  %v634_v33 = vadd.s32 %v618_v29, %v582_v28  ;;  %v323_v34 = vsel %vm307_vm0, 1, %v1543_v24  ;;  %v324_v35 = vsel %vm308_vm1, 1, %v1543_v24 }
  0xba   : > { %vm344_vm3 = vcmp.eq.s32.totalorder %v1842_v17, %v2086_v13  ;;  %v359_v36 = vsel %vm343_vm2, 1, %v1543_v24  ;;  %vm395_vm4 = vcmp.eq.s32.totalorder %v1844_v18, %v2060_v56  ;;  %vm396_vm5 = vcmp.eq.s32.totalorder %v1844_v18, %v2086_v13 }
  0xbb   : > { %v685_v37 = vadd.s32 %v669_v30, %v633_v32  ;;  %v686_v38 = vadd.s32 %v670_v31, %v634_v33  ;;  %v360_v39 = vsel %vm344_vm3, 1, %v1543_v24  ;;  %v375_v40 = vadd.s32 %v359_v36, %v323_v34 }
  0xbc   : > { %v376_v41 = vadd.s32 %v360_v39, %v324_v35  ;;  %v411_v42 = vsel %vm395_vm4, 1, %v1543_v24  ;;  %v412_v43 = vsel %vm396_vm5, 1, %v1543_v24  ;;  %vm447_vm6 = vcmp.eq.s32.totalorder %v1847_v20, %v2060_v56 }
  0xbd   : > { %v709_v44 = vcvt.s32.f32 %v685_v37  ;;  %v710_v45 = vcvt.s32.f32 %v686_v38  ;;  %v427_v46 = vadd.s32 %v411_v42, %v375_v40  ;;  %vm448_vm7 = vcmp.eq.s32.totalorder %v1847_v20, %v2086_v13 }
  0xbe   : > { %v428_v48 = vadd.s32 %v412_v43, %v376_v41  ;;  %v463_v49 = vsel %vm447_vm6, 1, %v1543_v24  ;;  %v464_v51 = vsel %vm448_vm7, 1, %v1543_v24  ;;  %vm499_vm8 = vcmp.eq.s32.totalorder %v1849_v21, %v2060_v56 }
  0xbf   : > { %v1187_v52 = vpack.c.bf16 %v710_v45, %v709_v44  ;;  %v479_v55 = vadd.s32 %v463_v49, %v427_v46  ;;  %vm500_vm9 = vcmp.eq.s32.totalorder %v1849_v21, %v2086_v13  ;;  %v515_v57 = vsel %vm499_vm8, 1, %v1543_v24 }
  0xc0   : > { %v480_v54 = vadd.s32 %v464_v51, %v428_v48  ;;  %v516_v58 = vsel %vm500_vm9, 1, %v1543_v24  ;;  %vm551_vm10 = vcmp.eq.s32.totalorder %v1851_v22, %v2060_v56  ;;  %vm552_vm11 = vcmp.eq.s32.totalorder %v1851_v22, %v2086_v13 }
  0xc1   : > { %1188 = vmatprep.subr.bf16.mxu0 %v1187_v52  ;;  %1215 = vmatprep.subr.bf16.mxu1 %v1187_v52  ;;  %v531_v59 = vadd.s32 %v515_v57, %v479_v55  ;;  %v567_v60 = vsel %vm551_vm10, 1, %v1543_v24  ;;  %v568_v61 = vsel %vm552_vm11, 1, %v1543_v24  ;;  %vm603_vm12 = vcmp.eq.s32.totalorder %v1853_v23, %v2060_v56 }
  0xc2   : > { %1190 = vmatpush3.bf16.msra.mxu0 %v1187_v52  ;;  %1223 = vmatpush3.bf16.msra.mxu1 %v1187_v52  ;;  %v532_v62 = vadd.s32 %v516_v58, %v480_v54  ;;  %vm604_vm13 = vcmp.eq.s32.totalorder %v1853_v23, %v2086_v13  ;;  %v619_v63 = vsel %vm603_vm12, 1, %v1543_v24  ;;  %vm655_vm14 = vcmp.eq.s32.totalorder %v1897_v47, %v2060_v56 }
  0xc3   : > { %v583_v0 = vadd.s32 %v567_v60, %v531_v59  ;;  %v620_v1 = vsel %vm604_vm13, 1, %v1543_v24  ;;  %vm656_vm15 = vcmp.eq.s32.totalorder %v1897_v47, %v2086_v13  ;;  %v671_v3 = vsel %vm655_vm14, 1, %v1543_v24 }
  0xc4   : > { %v584_v2 = vadd.s32 %v568_v61, %v532_v62  ;;  %v289_v4 = vadd.s32 96, %v1828_v7  ;;  %v290_v5 = vadd.s32 104, %v1828_v7  ;;  %v672_v8 = vsel %vm656_vm15, 1, %v1543_v24 }
  0xc5   : > { %v635_v6 = vadd.s32 %v619_v63, %v583_v0  ;;  %v2148_v9 = vadd.s32 112, %v1828_v7  ;;  %v2174_v37 = vadd.s32 120, %v1828_v7 }
  0xc6   : > { %v636_v56 = vadd.s32 %v620_v1, %v584_v2  ;;  %vm309_vm0 = vcmp.eq.s32.totalorder %v1840_v16, %v289_v4  ;;  %vm310_vm1 = vcmp.eq.s32.totalorder %v1840_v16, %v290_v5  ;;  %vm345_vm2 = vcmp.eq.s32.totalorder %v1842_v17, %v289_v4 }
  0xc7   : > { %v687_v10 = vadd.s32 %v671_v3, %v635_v6  ;;  %v325_v11 = vsel %vm309_vm0, 1, %v1543_v24  ;;  %v326_v50 = vsel %vm310_vm1, 1, %v1543_v24  ;;  %vm346_vm3 = vcmp.eq.s32.totalorder %v1842_v17, %v290_v5 }
  0xc8   : > { %v688_v53 = vadd.s32 %v672_v8, %v636_v56  ;;  %v361_v12 = vsel %vm345_vm2, 1, %v1543_v24  ;;  %v362_v13 = vsel %vm346_vm3, 1, %v1543_v24  ;;  %vm397_vm4 = vcmp.eq.s32.totalorder %v1844_v18, %v289_v4 }
  0xc9   : > { %v711_v14 = vcvt.s32.f32 %v687_v10  ;;  %v377_v15 = vadd.s32 %v361_v12, %v325_v11  ;;  %v378_v19 = vadd.s32 %v362_v13, %v326_v50  ;;  %vm398_vm5 = vcmp.eq.s32.totalorder %v1844_v18, %v290_v5 }
  0xca   : > { %v712_v25 = vcvt.s32.f32 %v688_v53  ;;  %v413_v26 = vsel %vm397_vm4, 1, %v1543_v24  ;;  %v414_v27 = vsel %vm398_vm5, 1, %v1543_v24  ;;  %vm449_vm6 = vcmp.eq.s32.totalorder %v1847_v20, %v289_v4 }
  0xcb   : > { %v429_v28 = vadd.s32 %v413_v26, %v377_v15  ;;  %v430_v29 = vadd.s32 %v414_v27, %v378_v19  ;;  %vm450_vm7 = vcmp.eq.s32.totalorder %v1847_v20, %v290_v5  ;;  %v465_v30 = vsel %vm449_vm6, 1, %v1543_v24  ;;  %v700_v26 = vld [vmem:[%s1811_s28 + $0x18] sm:$0xff] }
  0xcc   : > { %v1191_v31 = vpack.c.bf16 %v712_v25, %v711_v14  ;;  %v466_v32 = vsel %vm450_vm7, 1, %v1543_v24  ;;  %vm501_vm8 = vcmp.eq.s32.totalorder %v1849_v21, %v289_v4  ;;  %vm502_vm9 = vcmp.eq.s32.totalorder %v1849_v21, %v290_v5  ;;  %v696_v27 = vld [vmem:[%s1818_s24 + $0x18] sm:$0xff] }
  0xcd   : > { %v481_v33 = vadd.s32 %v465_v30, %v429_v28  ;;  %v482_v34 = vadd.s32 %v466_v32, %v430_v29  ;;  %v517_v35 = vsel %vm501_vm8, 1, %v1543_v24  ;;  %v518_v36 = vsel %vm502_vm9, 1, %v1543_v24  ;;  %v693_v28 = vld [vmem:[%s1818_s24] sm:$0xff]  ;;  %v695_v29 = vld [vmem:[%s1818_s24 + $0x10] sm:$0xff] }
  0xce   : > { %1192 = vmatprep.subr.bf16.mxu0 %v1191_v31  ;;  %1216 = vmatprep.subr.bf16.mxu1 %v1191_v31  ;;  %vm553_vm10 = vcmp.eq.s32.totalorder %v1851_v22, %v289_v4  ;;  %vm554_vm11 = vcmp.eq.s32.totalorder %v1851_v22, %v290_v5  ;;  %vm605_vm12 = vcmp.eq.s32.totalorder %v1853_v23, %v289_v4 }
  0xcf   : > { %1194 = vmatpush3.bf16.msra.mxu0 %v1191_v31  ;;  %1224 = vmatpush3.bf16.msra.mxu1 %v1191_v31  ;;  %v533_v38 = vadd.s32 %v517_v35, %v481_v33  ;;  %v534_v39 = vadd.s32 %v518_v36, %v482_v34  ;;  %v569_v40 = vsel %vm553_vm10, 1, %v1543_v24  ;;  %v570_v41 = vsel %vm554_vm11, 1, %v1543_v24 }
  0xd0   : > { %vm606_vm13 = vcmp.eq.s32.totalorder %v1853_v23, %v290_v5  ;;  %v621_v42 = vsel %vm605_vm12, 1, %v1543_v24  ;;  %vm657_vm14 = vcmp.eq.s32.totalorder %v1897_v47, %v289_v4  ;;  %vm658_vm15 = vcmp.eq.s32.totalorder %v1897_v47, %v290_v5 }
  0xd1   : > { %v585_v43 = vadd.s32 %v569_v40, %v533_v38  ;;  %v586_v44 = vadd.s32 %v570_v41, %v534_v39  ;;  %v622_v7 = vsel %vm606_vm13, 1, %v1543_v24  ;;  %v673_v45 = vsel %vm657_vm14, 1, %v1543_v24 }
  0xd2   : > { %v674_v46 = vsel %vm658_vm15, 1, %v1543_v24  ;;  %vm311_vm0 = vcmp.eq.s32.totalorder %v1840_v16, %v2148_v9  ;;  %vm312_vm1 = vcmp.eq.s32.totalorder %v1840_v16, %v2174_v37  ;;  %vm347_vm2 = vcmp.eq.s32.totalorder %v1842_v17, %v2148_v9 }
  0xd3   : > { %v637_v48 = vadd.s32 %v621_v42, %v585_v43  ;;  %v638_v49 = vadd.s32 %v622_v7, %v586_v44  ;;  %v327_v51 = vsel %vm311_vm0, 1, %v1543_v24  ;;  %v328_v52 = vsel %vm312_vm1, 1, %v1543_v24  ;;  %v818_v43 = vld [vmem:[%s2352_s2] sm:$0xff] (!%p1082_p5)  ;;  %v820_v44 = vld [vmem:[%s2352_s2 + $0x10] sm:$0xff] (!%p1082_p5) }
  0xd4   : > { %vm348_vm3 = vcmp.eq.s32.totalorder %v1842_v17, %v2174_v37  ;;  %v363_v55 = vsel %vm347_vm2, 1, %v1543_v24  ;;  %vm399_vm4 = vcmp.eq.s32.totalorder %v1844_v18, %v2148_v9  ;;  %vm400_vm5 = vcmp.eq.s32.totalorder %v1844_v18, %v2174_v37 }
  0xd5   : > { %v689_v16 = vadd.s32 %v673_v45, %v637_v48  ;;  %v690_v57 = vadd.s32 %v674_v46, %v638_v49  ;;  %v364_v54 = vsel %vm348_vm3, 1, %v1543_v24  ;;  %v379_v58 = vadd.s32 %v363_v55, %v327_v51  ;;  %v824_v46 = vld [vmem:[%s2353_s3 + $0x10] sm:$0xff] (!%p1082_p5)  ;;  %v822_v48 = vld [vmem:[%s2353_s3] sm:$0xff] (!%p1082_p5)  ;;  %v825_v49 = vld [vmem:[%s2353_s3 + $0x18] sm:$0xff] (!%p1082_p5) }
  0xd6   : > { %v380_v59 = vadd.s32 %v364_v54, %v328_v52  ;;  %v415_v60 = vsel %vm399_vm4, 1, %v1543_v24  ;;  %v416_v61 = vsel %vm400_vm5, 1, %v1543_v24  ;;  %vm451_vm6 = vcmp.eq.s32.totalorder %v1847_v20, %v2148_v9  ;;  %v823_v51 = vld [vmem:[%s2353_s3 + $0x8] sm:$0xff] (!%p1082_p5)  ;;  %v821_v55 = vld [vmem:[%s2352_s2 + $0x18] sm:$0xff] (!%p1082_p5) }
  0xd7   : > { %v713_v17 = vcvt.s32.f32 %v689_v16  ;;  %v714_v62 = vcvt.s32.f32 %v690_v57  ;;  %v431_v63 = vadd.s32 %v415_v60, %v379_v58  ;;  %vm452_vm7 = vcmp.eq.s32.totalorder %v1847_v20, %v2174_v37  ;;  %v819_v52 = vld [vmem:[%s2352_s2 + $0x8] sm:$0xff] (!%p1082_p5) }
  0xd8   : > { %v432_v18 = vadd.s32 %v416_v61, %v380_v59  ;;  %v467_v0 = vsel %vm451_vm6, 1, %v1543_v24  ;;  %v468_v1 = vsel %vm452_vm7, 1, %v1543_v24  ;;  %vm503_vm8 = vcmp.eq.s32.totalorder %v1849_v21, %v2148_v9 }
  0xd9   : > { %v1195_v2 = vpack.c.bf16 %v714_v62, %v713_v17  ;;  %v483_v3 = vadd.s32 %v467_v0, %v431_v63  ;;  %vm504_vm9 = vcmp.eq.s32.totalorder %v1849_v21, %v2174_v37  ;;  %v519_v4 = vsel %vm503_vm8, 1, %v1543_v24 }
  0xda   : > { %v484_v5 = vadd.s32 %v468_v1, %v432_v18  ;;  %v520_v6 = vsel %vm504_vm9, 1, %v1543_v24  ;;  %vm555_vm10 = vcmp.eq.s32.totalorder %v1851_v22, %v2148_v9  ;;  %vm556_vm11 = vcmp.eq.s32.totalorder %v1851_v22, %v2174_v37 }
  0xdb   : > { %1196 = vmatprep.subr.bf16.mxu0 %v1195_v2  ;;  %1217 = vmatprep.subr.bf16.mxu1 %v1195_v2  ;;  %v535_v20 = vadd.s32 %v519_v4, %v483_v3  ;;  %v571_v8 = vsel %vm555_vm10, 1, %v1543_v24  ;;  %v572_v56 = vsel %vm556_vm11, 1, %v1543_v24  ;;  %vm607_vm12 = vcmp.eq.s32.totalorder %v1853_v23, %v2148_v9 }
  0xdc   : > { %1198 = vmatpush3.bf16.msra.mxu0 %v1195_v2  ;;  %1225 = vmatpush3.bf16.msra.mxu1 %v1195_v2  ;;  %v536_v21 = vadd.s32 %v520_v6, %v484_v5  ;;  %vm608_vm13 = vcmp.eq.s32.totalorder %v1853_v23, %v2174_v37  ;;  %v623_v10 = vsel %vm607_vm12, 1, %v1543_v24  ;;  %vm659_vm14 = vcmp.eq.s32.totalorder %v1897_v47, %v2148_v9 }
  0xdd   : > { %v587_v22 = vadd.s32 %v571_v8, %v535_v20  ;;  %v624_v11 = vsel %vm608_vm13, 1, %v1543_v24  ;;  %vm660_vm15 = vcmp.eq.s32.totalorder %v1897_v47, %v2174_v37  ;;  %v675_v53 = vsel %vm659_vm14, 1, %v1543_v24  ;;  %v698_v47 = vld [vmem:[%s1811_s28 + $0x8] sm:$0xff] }
  0xde   : > { %v588_v50 = vadd.s32 %v572_v56, %v536_v21  ;;  %v676_v23 = vsel %vm660_vm15, 1, %v1543_v24  ;;  %v694_v24 = vld [vmem:[%s1818_s24 + $0x8] sm:$0xff]  ;;  %vm846_vm0 = vcmask (!%p1082_p5), 261120   ;;  %v1544_v7 = vmov (!%p1082_p5), 0  }
  0xdf   : > { %v639_v12 = vadd.s32 %v623_v10, %v587_v22  ;;  %1348 = vset.pattern.permute.xlu1 (!%p1082_p5), %v1544_v7  ;;  %1347 = vset.pattern.permute.xlu0 (!%p1082_p5), %v1544_v7 }
  0xe0   : > { %v640_v13 = vadd.s32 %v624_v11, %v588_v50  ;;  %838 = vperm.xlu1 (!%p1082_p5), %1348, %v824_v46   ;;  %828 = vperm.xlu0 (!%p1082_p5), %1347, %v822_v48  }
  0xe1   : > { %v691_v14 = vadd.s32 %v675_v53, %v639_v12 }
  0xe2   : > { %v692_v9 = vadd.s32 %v676_v23, %v640_v13 }
  0xe3   : > { %v715_v15 = vcvt.s32.f32 %v691_v14 }
  0xe4   : > { %v716_v19 = vcvt.s32.f32 %v692_v9  ;;  %843 = vperm.xlu1 (!%p1082_p5), %1348, %v825_v49   ;;  %833 = vperm.xlu0 (!%p1082_p5), %1347, %v823_v51  }
  0xe6   : > { %v1199_v25 = vpack.c.bf16 %v716_v19, %v715_v15 }
  0xe8   : > { %1200 = vmatprep.subr.bf16.mxu0 %v1199_v25  ;;  %1218 = vmatprep.subr.bf16.mxu1 %v1199_v25 }
  0xe9   : > { %1202 = vmatpush3.bf16.msra.mxu0 %v1199_v25  ;;  %1226 = vmatpush3.bf16.msra.mxu1 %v1199_v25 }
  0xec   : > { %1152 = vmatmul.mubr.f32.vlgmr.msra.gmra.mrb[0].mxu0 %v698_v47  ;;  %1155 = vmatmul.mubr.f32.vlgmr.msra.gmra.mrb[0].mxu1 %v700_v26 }
  0xed   : > { %1165 = vmatprep.mubr.msk.f32.mxu0 (!%p1082_p5), %vm846_vm0, %v818_v43  ;;  %1168 = vmatprep.mubr.msk.f32.mxu1 (!%p1082_p5), %vm846_vm0, %v820_v44 }
 0x15f   : > { %v839_v16 = vpop.permute.xlu1 (!%p1082_p5), %838  ;;  %v829_v57 = vpop.permute.xlu0 (!%p1082_p5), %828 }
 0x163   : > { %v844_v54 = vpop.permute.xlu1 (!%p1082_p5), %843  ;;  %v834_v58 = vpop.permute.xlu0 (!%p1082_p5), %833 }
 0x1bd   : > { %813 = sbr.rel (%p1082_p5) target bundleno = 685 (0x2ad), region = 52 }
 0x1bf   : > { %v1153_v30 = vpop.f32.mrb[0].mxu0  ;;  %v1156_v31 = vpop.f32.mrb[0].mxu1 }
 0x1c0   : > { %v803_v32 = vadd.f32 %v1153_v30, %v694_v24  ;;  %v805_v33 = vadd.f32 %v1156_v31, %v696_v27  ;;  %v783_v34 = vpop.f32.mrb[1].mxu0  ;;  %v793_v35 = vpop.f32.mrb[1].mxu1 }
 0x1c1   : > { %v802_v36 = vadd.f32 %v783_v34, %v693_v28  ;;  %v804_v37 = vadd.f32 %v793_v35, %v695_v29 }
 0x1c2   : > { %807 = vst [vmem:[%s1818_s24 + $0x8] sm:$0xff] %v803_v32  ;;  %809 = vst [vmem:[%s1818_s24 + $0x18] sm:$0xff] %v805_v33 }
 0x1c3   : > { %806 = vst [vmem:[%s1818_s24] sm:$0xff] %v802_v36  ;;  %808 = vst [vmem:[%s1818_s24 + $0x10] sm:$0xff] %v804_v37 }
 0x1c9   : > { %v815_v39 = vld [vmem:[%s1818_s24 + $0x8] sm:$0xff]  ;;  %v817_v42 = vld [vmem:[%s1818_s24 + $0x18] sm:$0xff] }
 0x1ca   : > { %v814_v38 = vld [vmem:[%s1818_s24] sm:$0xff]  ;;  %v816_v40 = vld [vmem:[%s1818_s24 + $0x10] sm:$0xff] }
 0x1cb   : > { %v1203_v41 = vpack.c.bf16 %v815_v39, %v814_v38  ;;  %v1207_v45 = vpack.c.bf16 %v817_v42, %v816_v40 }
 0x1cd   : > { %1204 = vmatprep.subr.bf16.mxu0 %v1203_v41  ;;  %1227 = vmatprep.subr.bf16.mxu1 %v1203_v41 }
 0x1ce   : > { %1206 = vmatpush3.bf16.msra.mxu0 %v1203_v41  ;;  %1229 = vmatpush3.bf16.msra.mxu1 %v1203_v41 }
 0x1cf   : > { %1208 = vmatprep.subr.bf16.mxu0 %v1207_v45  ;;  %1228 = vmatprep.subr.bf16.mxu1 %v1207_v45 }
 0x1d2   : > { %1210 = vmatpush3.bf16.msra.mxu0 %v1207_v45  ;;  %1230 = vmatpush3.bf16.msra.mxu1 %v1207_v45 }
 0x1d5   : > { %1166 = vmatmul.mubr.msk.f32.vlgmr.msra.gmra.mrb[0].mxu0 %vm846_vm0, %v819_v52  ;;  %1169 = vmatmul.mubr.msk.f32.vlgmr.msra.gmra.mrb[0].mxu1 %vm846_vm0, %v821_v55 }
 0x2a8   : > { %v1167_v59 = vpop.f32.mrb[0].mxu0  ;;  %v1170_v60 = vpop.f32.mrb[0].mxu1 }
 0x2a9   : > { %v931_v61 = vadd.f32 %v1167_v59, %v834_v58  ;;  %v941_v17 = vadd.f32 %v1170_v60, %v844_v54  ;;  %v925_v62 = vpop.f32.mrb[1].mxu0  ;;  %v935_v63 = vpop.f32.mrb[1].mxu1 }
 0x2aa   : > { %v926_v18 = vadd.f32 %v925_v62, %v829_v57  ;;  %v936_v0 = vadd.f32 %v935_v63, %v839_v16 }
 0x2ab   : > { %945 = vst [vmem:[%s1818_s24 + $0x8] sm:$0xff] %v931_v61  ;;  %947 = vst [vmem:[%s1818_s24 + $0x18] sm:$0xff] %v941_v17 }
 0x2ac   : > { %944 = vst [vmem:[%s1818_s24] sm:$0xff] %v926_v18  ;;  %946 = vst [vmem:[%s1818_s24 + $0x10] sm:$0xff] %v936_v0 }
 0x2ad PF: > { %s1088_s0 = sshll.u32 %s1523_s22, 7  ;;  %s961_s26 = sshll.u32 %s1818_s24, 4  ;;  %s2287_s26 = int_to_ptr.vmem [resolvable:$true] %s961_s26 }
 0x2ae   : > { %s2284_s21 = scalar_lea.hbm %s2354_s4, %s1088_s0  ;;  %s949_s12 = scalar_lea.sflag [#allocation4], %s1802_s5 }
 0x2af   : > { %s1409_s10 = scalar_lea.vmem %s2287_s26, 512  ;;  %p2384_p12 = scmp.ne.s32.totalorder %s2374_s15, 0 }
 0x2b0   : > { %p1410_p4 = scmp.ne.s32.totalorder %s2287_s26, %s1409_s10  ;;  %s1545_s6 = smov [#allocation7]  }
 0x2b1   : > { %s1413_s29 = sshll.u32 %s1545_s6, 4  ;;  %s1414_s29 = int_to_ptr.vmem [resolvable:$false] %s1413_s29 }
 0x2b2   : > { %p1411_p9 = pnand %p1410_p4, %p2384_p12  ;;  %s1415_s22 = scalar_lea.vmem %s1414_s29, 1024 }
 0x2b3   : > { %p1416_p2 = scmp.lt.s32.totalorder %s2287_s26, %s1414_s29  ;;  %p1417_p7 = scmp.lt.s32.totalorder %s1415_s22, %s1409_s10 }
 0x2b4   : > { %p1412_p8 = pneg %p1411_p9 }
 0x2b5   : > { %p1418_p1 = por %p1417_p7, %p1416_p2 }
 0x2b7   : > { %p1419_p10 = pnand %p1418_p1, %p1412_p8 }
 0x2b9   : > { %1422 = shalt.err (!%p1419_p10)
}
 0x2ba   : > { %s1423_s24 = scalar_lea.hbm %s2284_s21, 512  ;;  %s1427_s28 = scalar_lea.hbm %s2354_s4, 1536 }
 0x2bb   : > { %p1424_p11 = scmp.ne.s32.totalorder %s2284_s21, %s1423_s24  ;;  %p1428_p6 = scmp.lt.u32.totalorder %s2284_s21, %s2354_s4 }
 0x2bc   : > { %p1429_p0 = scmp.lt.u32.totalorder %s1427_s28, %s1423_s24  ;;  %p1431_p4 = scmp.lt.u32.totalorder %s1423_s24, %s2284_s21 }
 0x2bd   : > { %p1425_p3 = pnand %p1424_p11, %p2384_p12 }
 0x2be   : > { %p1430_p5 = por %p1429_p0, %p1428_p6 }
 0x2bf   : > { %p1426_p13 = pneg %p1425_p3 }
 0x2c0   : > { %p1432_p9 = por %p1431_p4, %p1430_p5 }
 0x2c2   : > { %p1433_p8 = pnand %p1432_p9, %p1426_p13 }
 0x2c4   : > { %1436 = shalt.err (!%p1433_p8)
}
 0x2c5   : > { %s1546_s14 = smov 128   ;;  %s1547_s0 = smov 384  }
 0x2c6   : > { %s1548_s23 = smov 8  }
 0x2c7   : > { %1235 = dma.vmem_to_hbm [thread:$0]  (%p2384_p12), %s2287_s26, 512, %s2284_s21, %s949_s12, %s1546_s14, %s1547_s0, %s1548_s23  }
 0x2c8 PF: > { %p1249_p2 = scmp.ge.s32.totalorder %s1535_s25, 2  ;;  %s976_s7 = sand.u32 1, %s1507_s18  }
 0x2c9   : > { %p2385_p7 = scmp.ne.s32.totalorder %s2376_s30, 0  ;;  %s977_s10 = scalar_lea.sflag [#allocation4], %s976_s7 }
 0x2cb   : > { %p1245_p1 = pnand %p1249_p2, %p2385_p7 }
 0x2cd   : > { %1490 = dma.done.wait (!%p1245_p1), %s977_s10, 512  }
 0x2ce   : > { %1492 = vsyncadd (!%p1245_p1), %s977_s10, 4294966784  ;;  %s23_s25 = sadd.s32 1, %s1535_s25   ;;  %s2386_s5 = sld [smem:[#allocation15_spill]] }
 0x2cf   : > { %p20_p10 = scmp.ge.s32.totalorder %s23_s25, 11   ;;  %s2387_s21 = sld [smem:[#allocation11_spill]] }
 0x2d0   : > { %s2388_s22 = sld [smem:[#allocation12_spill]]  ;;  %s2389_s23 = sld [smem:[#allocation13_spill]] }
 0x2d1   : > { %s2390_s24 = sld [smem:[#allocation14_spill]]  ;;  %s2391_s15 = smov %s1499_s16 }
 0x2d2   : > { %s2392_s16 = smov %s1503_s17  ;;  %s2393_s17 = smov %s1676_s11 }
 0x2d3   : > { %s2394_s18 = smov %s1511_s19  ;;  %s2395_s19 = smov %s1515_s20 }
 0x2d4   : > { %s2396_s20 = smov %s2386_s5  ;;  %22 = sbr.rel (!%p20_p10) target bundleno = 13 (0xd), region = 102 }
 0x2db   :  { %982 = vsyncpa [#allocation3], 1 }
 0x2dc   :  { %984 = vsyncpa [#allocation3 + $0x1], 1 }
 0x2dd   :  { %985 = vsyncpa [#allocation6], 1 }
 0x2de   :  { %987 = vsyncpa [#allocation6 + $0x1], 1 }
 0x2df   :  { %988 = vsyncpa [#allocation4], 1 }
 0x2e0   :  { %990 = vsyncpa [#allocation4 + $0x1], 1 }

</bundles_post_ra>
